<compile_context>
chip_gen: v7x
topology: tpu7x:2x2x1
jax: 0.10.0
libtpu: 0.0.40
codegen_flags: <defaults>
</compile_context>

<pallas_src>
import jax
import jax.numpy as jnp
from jax.experimental import pallas as pl
from jax.experimental.pallas import tpu as pltpu

LANE = 128


def _round_up(x, m):
    return ((x + m - 1) // m) * m


def _cdiv(a, b):
    return (a + b - 1) // b


def _make_mlp_kernel(n_mid):
    """Fused MLP: layer0 -> ReLU -> [hidden -> ReLU]*n_mid -> last, all in VMEM."""

    def kernel(x_ref, w0_ref, b0_ref, wm_ref, bm_ref, wl_ref, bl_ref, out_ref):
        # Layer 0: (bt, K0) @ (K0, D).  bf16 MXU operands, f32 accumulation.
        h = jnp.dot(x_ref[...].astype(jnp.bfloat16), w0_ref[...],
                    preferred_element_type=jnp.float32) + b0_ref[...]
        h = jnp.maximum(h, 0.0)

        # Hidden layers: static unroll over the packed (n_mid, D, D) buffer.
        for i in range(n_mid):
            h = jnp.dot(h.astype(jnp.bfloat16), wm_ref[i],
                        preferred_element_type=jnp.float32) + bm_ref[i]
            h = jnp.maximum(h, 0.0)

        # Last layer produces only latent_dim lanes -> lean HBM writeback.
        z = jnp.dot(h.astype(jnp.bfloat16), wl_ref[...],
                    preferred_element_type=jnp.float32) + bl_ref[...]
        out_ref[...] = z.astype(out_ref.dtype)

    return kernel


def _choose_tiling(B, cap=4096):
    """Balanced batch tiles: >=2 (even) steps when possible, minimal padding."""
    n_steps = _cdiv(B, cap)
    if B >= 16:                      # enough rows for two >=8-row tiles
        n_steps = max(n_steps, 2)    # let both v7x TensorCores get work
    if n_steps > 1 and n_steps % 2:
        n_steps += 1                 # even split shards evenly across 2 TCs
    batch_tile = _round_up(_cdiv(B, n_steps), 8)
    B_pad = _round_up(B, batch_tile)
    return batch_tile, B_pad


def encoder_forward(x, weights, biases, *, batch_tile=None):
    """Encoder forward pass with a single fused Pallas kernel.

    x:       (B, input_dim) float32
    weights: list of (in_i, out_i) float32  (already transposed vs. PyTorch)
    biases:  list of (out_i,) or (1, out_i) float32
    """
    n_layers = len(weights)
    assert n_layers >= 2, "Encoder always has >= 2 Linear layers"
    B, in_dim = x.shape
    latent_dim = weights[-1].shape[1]
    hidden_dims = [w.shape[1] for w in weights[:-1]]

    D = _round_up(max(hidden_dims), LANE)   # uniform padded hidden width
    K0 = _round_up(in_dim, 16)              # clean K=16 bf16 contraction for layer 0
    n_mid = n_layers - 2

    # ---- pack parameters (zero-padded; bf16 weights, f32 biases) ----
    w0 = jnp.zeros((K0, D), jnp.float32)
    w0 = w0.at[:in_dim, :hidden_dims[0]].set(weights[0]).astype(jnp.bfloat16)
    b0 = jnp.zeros((1, D), jnp.float32)
    b0 = b0.at[:, :hidden_dims[0]].set(jnp.reshape(biases[0], (1, -1)))

    n_mid_buf = max(n_mid, 1)               # dummy (unused) buffer if no middle layers
    wm = jnp.zeros((n_mid_buf, D, D), jnp.float32)
    bm = jnp.zeros((n_mid_buf, 1, D), jnp.float32)
    for i in range(n_mid):
        w, b = weights[1 + i], biases[1 + i]
        fi, fo = w.shape
        wm = wm.at[i, :fi, :fo].set(w)
        bm = bm.at[i, :, :fo].set(jnp.reshape(b, (1, fo)))
    wm = wm.astype(jnp.bfloat16)

    fi_last = weights[-1].shape[0]
    wl = jnp.zeros((D, latent_dim), jnp.float32)
    wl = wl.at[:fi_last, :].set(weights[-1]).astype(jnp.bfloat16)
    bl = jnp.reshape(biases[-1], (1, latent_dim)).astype(jnp.float32)

    # ---- batch tiling / padding ----
    if batch_tile is None:
        batch_tile, B_pad = _choose_tiling(B)
    else:
        batch_tile = _round_up(batch_tile, 8)
        B_pad = _round_up(B, batch_tile)
    xp = x
    if (B_pad != B) or (K0 != in_dim):
        xp = jnp.pad(x, ((0, B_pad - B), (0, K0 - in_dim)))
    grid = (B_pad // batch_tile,)

    in_specs = [
        pl.BlockSpec((batch_tile, K0), lambda i: (i, 0)),          # streamed x tile
        pl.BlockSpec((K0, D), lambda i: (0, 0)),                   # layer-0 weight (resident)
        pl.BlockSpec((1, D), lambda i: (0, 0)),                    # layer-0 bias
        pl.BlockSpec((n_mid_buf, D, D), lambda i: (0, 0, 0)),      # packed hidden weights
        pl.BlockSpec((n_mid_buf, 1, D), lambda i: (0, 0, 0)),      # packed hidden biases
        pl.BlockSpec((D, latent_dim), lambda i: (0, 0)),           # last-layer weight
        pl.BlockSpec((1, latent_dim), lambda i: (0, 0)),           # last-layer bias
    ]
    out_spec = pl.BlockSpec((batch_tile, latent_dim), lambda i: (i, 0))

    z = pl.pallas_call(
        _make_mlp_kernel(n_mid),
        out_shape=jax.ShapeDtypeStruct((B_pad, latent_dim), jnp.float32),
        grid=grid,
        in_specs=in_specs,
        out_specs=out_spec,
        compiler_params=pltpu.CompilerParams(
            dimension_semantics=("parallel",),
        ),
    )(xp, w0, b0, wm, bm, wl, bl)

    return z if B_pad == B else z[:B]


def init_encoder_params(key, input_dim, latent_dim, layers):
    """Deterministic init mimicking nn.Linear default (uniform +- 1/sqrt(fan_in))."""
    dims = [input_dim] + list(layers) + [latent_dim]
    weights, biases = [], []
    for i in range(len(dims) - 1):
        fan_in, fan_out = dims[i], dims[i + 1]
        key, kw, kb = jax.random.split(key, 3)
        bound = 1.0 / jnp.sqrt(jnp.float32(fan_in))
        w = jax.random.uniform(kw, (fan_in, fan_out), jnp.float32, -bound, bound)
        b = jax.random.uniform(kb, (1, fan_out), jnp.float32, -bound, bound)
        weights.append(w)   # stored already transposed: (in, out)
        biases.append(b)
    return weights, biases


def encoder_reference(x, weights, biases):
    h = x
    for i, (w, b) in enumerate(zip(weights, biases)):
        h = h @ w + jnp.reshape(b, (1, -1))
        if i < len(weights) - 1:
            h = jnp.maximum(h, 0.0)
    return h


if __name__ == "__main__":
    input_dim = 9            # len(['pcx','pcy','pcz','pox','poy','poz','psx','psy','psz'])
    latent_dim = 64
    hidden_layers = [32, 32]
    batch = 24               # exercises 2-step parallel grid + batch-pad row slice

    key = jax.random.PRNGKey(0)
    key, kx = jax.random.split(key)
    x = jax.random.normal(kx, (batch, input_dim), jnp.float32)

    weights, biases = init_encoder_params(key, input_dim, latent_dim, hidden_layers)

    z = jax.block_until_ready(encoder_forward(x, weights, biases))
    z_ref = encoder_reference(x, weights, biases)

    assert z.shape == (batch, latent_dim)
    # Kernel uses bf16 MXU operands with f32 accumulation -> small quantization error.
    assert jnp.allclose(z, z_ref, atol=2e-2, rtol=2e-2), float(jnp.max(jnp.abs(z - z_ref)))

    print("KERNEL_OK")
</pallas_src>

<mosaic_0001>
module attributes {stable_mosaic.version = 11 : i64} {
  func.func @kernel(%arg0: i32, %arg1: memref<16x16xf32, #tpu.memory_space<vmem>>, %arg2: memref<16x128xbf16, #tpu.memory_space<vmem>>, %arg3: memref<1x128xf32, #tpu.memory_space<vmem>>, %arg4: memref<1x128x128xbf16, #tpu.memory_space<vmem>>, %arg5: memref<1x1x128xf32, #tpu.memory_space<vmem>>, %arg6: memref<128x64xbf16, #tpu.memory_space<vmem>>, %arg7: memref<1x64xf32, #tpu.memory_space<vmem>>, %arg8: memref<16x64xf32, #tpu.memory_space<vmem>>) attributes {dimension_semantics = [#tpu.dimension_semantics<parallel>], iteration_bounds = array<i64: 2>, scalar_prefetch = 0 : i64, scratch_operands = 0 : i64, tpu.core_type = #tpu.core_type<tc>, window_params = [{transform_indices = @transform_0, window_bounds = array<i64: 16, 16>}, {pipeline_mode = #tpu.pipeline_mode<synchronous>, transform_indices = @transform_1, window_bounds = array<i64: 16, 128>}, {pipeline_mode = #tpu.pipeline_mode<synchronous>, transform_indices = @transform_2, window_bounds = array<i64: 1, 128>}, {pipeline_mode = #tpu.pipeline_mode<synchronous>, transform_indices = @transform_3, window_bounds = array<i64: 1, 128, 128>}, {pipeline_mode = #tpu.pipeline_mode<synchronous>, transform_indices = @transform_4, window_bounds = array<i64: 1, 1, 128>}, {pipeline_mode = #tpu.pipeline_mode<synchronous>, transform_indices = @transform_5, window_bounds = array<i64: 128, 64>}, {pipeline_mode = #tpu.pipeline_mode<synchronous>, transform_indices = @transform_6, window_bounds = array<i64: 1, 64>}, {transform_indices = @transform_7, window_bounds = array<i64: 16, 64>}]} {
    %c0 = arith.constant 0 : index
    %c0_0 = arith.constant 0 : index
    %0 = vector.load %arg1[%c0, %c0_0] : memref<16x16xf32, #tpu.memory_space<vmem>>, vector<16x16xf32>
    %1 = arith.truncf %0 : vector<16x16xf32> to vector<16x16xbf16>
    %c0_1 = arith.constant 0 : index
    %c0_2 = arith.constant 0 : index
    %2 = vector.load %arg2[%c0_1, %c0_2] : memref<16x128xbf16, #tpu.memory_space<vmem>>, vector<16x128xbf16>
    %cst = arith.constant dense<0.000000e+00> : vector<16x128xf32>
    %3 = tpu.matmul %1, %2, %cst {dimension_numbers = #tpu.dot_dimension_numbers<[1], [0], [0], [1], [0, 0, 1, 1], [], []>} : vector<16x16xbf16>, vector<16x128xbf16>, vector<16x128xf32> -> vector<16x128xf32>
    %c0_3 = arith.constant 0 : index
    %c0_4 = arith.constant 0 : index
    %4 = vector.load %arg3[%c0_3, %c0_4] : memref<1x128xf32, #tpu.memory_space<vmem>>, vector<1x128xf32>
    %5 = vector.broadcast %4 : vector<1x128xf32> to vector<16x128xf32>
    %6 = arith.addf %3, %5 : vector<16x128xf32>
    %cst_5 = arith.constant 0.000000e+00 : f32
    %7 = vector.broadcast %cst_5 : f32 to vector<16x128xf32>
    %8 = arith.maximumf %6, %7 : vector<16x128xf32>
    %9 = arith.truncf %8 : vector<16x128xf32> to vector<16x128xbf16>
    %c0_6 = arith.constant 0 : index
    %c0_7 = arith.constant 0 : index
    %c0_8 = arith.constant 0 : index
    %10 = vector.load %arg4[%c0_6, %c0_7, %c0_8] : memref<1x128x128xbf16, #tpu.memory_space<vmem>>, vector<1x128x128xbf16>
    %11 = vector.shape_cast %10 : vector<1x128x128xbf16> to vector<128x128xbf16>
    %cst_9 = arith.constant dense<0.000000e+00> : vector<16x128xf32>
    %12 = tpu.matmul %9, %11, %cst_9 {dimension_numbers = #tpu.dot_dimension_numbers<[1], [0], [0], [1], [0, 0, 1, 1], [], []>} : vector<16x128xbf16>, vector<128x128xbf16>, vector<16x128xf32> -> vector<16x128xf32>
    %c0_10 = arith.constant 0 : index
    %c0_11 = arith.constant 0 : index
    %c0_12 = arith.constant 0 : index
    %13 = vector.load %arg5[%c0_10, %c0_11, %c0_12] : memref<1x1x128xf32, #tpu.memory_space<vmem>>, vector<1x1x128xf32>
    %14 = vector.shape_cast %13 : vector<1x1x128xf32> to vector<1x128xf32>
    %15 = vector.broadcast %14 : vector<1x128xf32> to vector<16x128xf32>
    %16 = arith.addf %12, %15 : vector<16x128xf32>
    %cst_13 = arith.constant 0.000000e+00 : f32
    %17 = vector.broadcast %cst_13 : f32 to vector<16x128xf32>
    %18 = arith.maximumf %16, %17 : vector<16x128xf32>
    %19 = arith.truncf %18 : vector<16x128xf32> to vector<16x128xbf16>
    %c0_14 = arith.constant 0 : index
    %c0_15 = arith.constant 0 : index
    %20 = vector.load %arg6[%c0_14, %c0_15] : memref<128x64xbf16, #tpu.memory_space<vmem>>, vector<128x64xbf16>
    %cst_16 = arith.constant dense<0.000000e+00> : vector<16x64xf32>
    %21 = tpu.matmul %19, %20, %cst_16 {dimension_numbers = #tpu.dot_dimension_numbers<[1], [0], [0], [1], [0, 0, 1, 1], [], []>} : vector<16x128xbf16>, vector<128x64xbf16>, vector<16x64xf32> -> vector<16x64xf32>
    %c0_17 = arith.constant 0 : index
    %c0_18 = arith.constant 0 : index
    %22 = vector.load %arg7[%c0_17, %c0_18] : memref<1x64xf32, #tpu.memory_space<vmem>>, vector<1x64xf32>
    %23 = vector.broadcast %22 : vector<1x64xf32> to vector<16x64xf32>
    %24 = arith.addf %21, %23 : vector<16x64xf32>
    %c0_19 = arith.constant 0 : index
    %c0_20 = arith.constant 0 : index
    %25 = vector.load %arg8[%c0_19, %c0_20] : memref<16x64xf32, #tpu.memory_space<vmem>>, vector<16x64xf32>
    tpu.vector_store %arg8[%c0_19, %c0_20], %24 {strides = array<i32>} : memref<16x64xf32, #tpu.memory_space<vmem>>, vector<16x64xf32>,
    return
  }
  func.func @transform_0(%arg0: i32) -> (i32, i32) {
    %c0_i32 = arith.constant 0 : i32
    %c0_i32_0 = arith.constant 0 : i32
    return %arg0, %c0_i32 : i32, i32
  }
  func.func @transform_1(%arg0: i32) -> (i32, i32) {
    %c0_i32 = arith.constant 0 : i32
    %c0_i32_0 = arith.constant 0 : i32
    %c0_i32_1 = arith.constant 0 : i32
    return %c0_i32, %c0_i32_0 : i32, i32
  }
  func.func @transform_2(%arg0: i32) -> (i32, i32) {
    %c0_i32 = arith.constant 0 : i32
    %c0_i32_0 = arith.constant 0 : i32
    %c0_i32_1 = arith.constant 0 : i32
    return %c0_i32, %c0_i32_0 : i32, i32
  }
  func.func @transform_3(%arg0: i32) -> (i32, i32, i32) {
    %c0_i32 = arith.constant 0 : i32
    %c0_i32_0 = arith.constant 0 : i32
    %c0_i32_1 = arith.constant 0 : i32
    %c0_i32_2 = arith.constant 0 : i32
    return %c0_i32, %c0_i32_0, %c0_i32_1 : i32, i32, i32
  }
  func.func @transform_4(%arg0: i32) -> (i32, i32, i32) {
    %c0_i32 = arith.constant 0 : i32
    %c0_i32_0 = arith.constant 0 : i32
    %c0_i32_1 = arith.constant 0 : i32
    %c0_i32_2 = arith.constant 0 : i32
    return %c0_i32, %c0_i32_0, %c0_i32_1 : i32, i32, i32
  }
  func.func @transform_5(%arg0: i32) -> (i32, i32) {
    %c0_i32 = arith.constant 0 : i32
    %c0_i32_0 = arith.constant 0 : i32
    %c0_i32_1 = arith.constant 0 : i32
    return %c0_i32, %c0_i32_0 : i32, i32
  }
  func.func @transform_6(%arg0: i32) -> (i32, i32) {
    %c0_i32 = arith.constant 0 : i32
    %c0_i32_0 = arith.constant 0 : i32
    %c0_i32_1 = arith.constant 0 : i32
    return %c0_i32, %c0_i32_0 : i32, i32
  }
  func.func @transform_7(%arg0: i32) -> (i32, i32) {
    %c0_i32 = arith.constant 0 : i32
    %c0_i32_0 = arith.constant 0 : i32
    return %arg0, %c0_i32 : i32, i32
  }
}

</mosaic_0001>

<bundles_post_ra>
// kernel: tpu_custom_call.1
= control target key start
LH: loop header
LB: loop body
LE: loop exit
PB: predicated region body
PF: predicated region fallthrough
CT: control target
= control target key end

     0   :  { %12 = vsyncpa [#allocation3], 0  ;;  %s1107_s0 = inlined_call_operand.vmem [shape: f32[32,16], index: 0, kind: input, shape index: {}]   ;;  %s1108_s1 = inlined_call_operand.vmem [shape: bf16[16,128], index: 1, kind: input, shape index: {}]   ;;  %s1109_s2 = inlined_call_operand.vmem [shape: f32[1,128], index: 2, kind: input, shape index: {}]   ;;  %s1110_s3 = inlined_call_operand.vmem [shape: bf16[1,128,128], index: 3, kind: input, shape index: {}]   ;;  %s1111_s4 = inlined_call_operand.vmem [shape: f32[1,1,128], index: 4, kind: input, shape index: {}]   ;;  %s1112_s5 = inlined_call_operand.vmem [shape: bf16[128,64], index: 5, kind: input, shape index: {}]   ;;  %s1113_s6 = inlined_call_operand.vmem [shape: f32[1,64], index: 6, kind: input, shape index: {}]   ;;  %s1114_s7 = inlined_call_operand.hbm [shape: f32[32,64], index: 7, kind: output, shape index: {}]  }
   0x1   :  { %14 = vsyncpa [#allocation3 + $0x1], 0  ;;  %s922_s24 = smov 0   ;;  %s924_s25 = smov 0  }
   0x2   :  { %s926_s26 = smov 0   ;;  %s928_s27 = smov 0  }
   0x3 LB: > { %s943_s28 = sadd.s32 4294967295, %s875_s27   ;;  %s653_s29 = sadd.s32 4294967294, %s875_s27   ;;  %s875_s27 = sphi %s928_s27, %s1120_s27   ;;  %s871_s26 = sphi %s926_s26, %s1119_s26   ;;  %s867_s25 = sphi %s924_s25, %s1118_s25   ;;  %s863_s24 = sphi %s922_s24, %s1117_s24  }
   0x4   : > { %s947_s30 = sadd.s32 1, %s875_s27   ;;  %s179_s8 = sadd.s32 1, %s871_s26 }
   0x5   : > { %s176_s9 = ssub.s32 %s875_s27, %s947_s30  ;;  %p189_p0 = scmp.ne.s32.totalorder %s871_s26, %s867_s25 }
   0x6   : > { %p177_p1 = scmp.eq.s32.totalorder %s176_s9, 0  ;;  %p190_p2 = scmp.eq.s32.totalorder %s943_s28, 1 }
   0x7   : > { %p195_p3 = scmp.ne.s32.totalorder %s867_s25, %s863_s24  ;;  %p196_p4 = scmp.eq.s32.totalorder %s653_s29, 1 }
   0x8   : > { %s958_s10 = scalar_select %p177_p1, %s871_s26, %s179_s8  }
   0x9   : > { %p960_p5 = por %p190_p2, %p189_p0  ;;  %p964_p6 = por %p196_p4, %p195_p3 }
   0xa   : > { %p656_p7 = scmp.ge.s32.totalorder %s875_s27, 1  ;;  %p241_p8 = scmp.lt.s32.totalorder %s875_s27, 3 }
   0xc   : > { %p242_p9 = pnand %p656_p7, %p241_p8 }
   0xd   : > { %v796_v0 = vld [vmem:[%s1108_s1] sm:$0xff] (!%p242_p9)   ;;  %v877_v1 = vmov (!%p242_p9), 0.0   ;;  %s658_s15 = sshll.u32 (!%p242_p9), %s943_s28, 1  ;;  %vm878_vm0 = vmmov (!%p242_p9), 0   ;;  %v798_v3 = vld [vmem:[%s1110_s3 + $0x8] sm:$0xff] (!%p242_p9)   ;;  %v799_v4 = vld [vmem:[%s1110_s3 + $0x10] sm:$0xff] (!%p242_p9)  }
   0xe   : > { %245 = sbr.rel (%p242_p9) target bundleno = 698 (0x2ba), region = 48  ;;  %707 = vmatprep.subr.bf16.mxu0 (!%p242_p9), %v877_v1  ;;  %713 = vmatprep.subr.bf16.mxu1 (!%p242_p9), %v877_v1  ;;  %v797_v2 = vld [vmem:[%s1110_s3] sm:$0xff] (!%p242_p9)   ;;  %p274_p10 = scmp.lt.s32.totalorder (!%p242_p9), %s658_s15, 3  ;;  %vm299_vm1 = vcmask (!%p242_p9), 130048   ;;  %v800_v8 = vld [vmem:[%s1110_s3 + $0x18] sm:$0xff] (!%p242_p9)   ;;  %v802_v10 = vld [vmem:[%s1110_s3 + $0x28] sm:$0xff] (!%p242_p9)  }
   0xf   : > { %708 = vmatpush3.bf16.msra.mxu0 (!%p242_p9), %v796_v0  ;;  %709 = vmatprep.mubr.msk.bf16.mxu0 (!%p242_p9), %vm878_vm0, %v877_v1  ;;  %v801_v9 = vld [vmem:[%s1110_s3 + $0x20] sm:$0xff] (!%p242_p9)   ;;  %v803_v11 = vld [vmem:[%s1110_s3 + $0x30] sm:$0xff] (!%p242_p9)   ;;  %v804_v12 = vld [vmem:[%s1110_s3 + $0x38] sm:$0xff] (!%p242_p9)   ;;  %s270_s14 = sand.u32 (!%p242_p9), 1, %s867_s25   ;;  %vm574_vm2 = vcmask (!%p242_p9), 523264   ;;  %s879_s8 = smov (!%p242_p9), [#allocation2]  }
  0x10   : > { %714 = vmatpush3.bf16.msra.mxu1 (!%p242_p9), %v797_v2  ;;  %729 = vmatprep.mubr.msk.bf16.mxu1 (!%p242_p9), %vm878_vm0, %v877_v1  ;;  %v805_v13 = vld [vmem:[%s1112_s5] sm:$0xff] (!%p242_p9)   ;;  %v806_v14 = vld [vmem:[%s1112_s5 + $0x8] sm:$0xff] (!%p242_p9)   ;;  %v807_v15 = vld [vmem:[%s1112_s5 + $0x10] sm:$0xff] (!%p242_p9)   ;;  %s817_s9 = sshll.u32 (!%p242_p9), %s879_s8, 4  ;;  %s818_s9 = int_to_ptr.vmem [resolvable:$false] %s817_s9 }
  0x11   : > { %715 = vmatprep.subr.bf16.mxu1 (!%p242_p9), %v877_v1  ;;  %733 = vmatprep.subr.bf16.mxu0 (!%p242_p9), %v877_v1  ;;  %v808_v16 = vld [vmem:[%s1112_s5 + $0x18] sm:$0xff] (!%p242_p9)   ;;  %v809_v17 = vld [vmem:[%s1112_s5 + $0x20] sm:$0xff] (!%p242_p9)   ;;  %v810_v18 = vld [vmem:[%s1112_s5 + $0x28] sm:$0xff] (!%p242_p9)   ;;  %s819_s13 = scalar_lea.vmem (!%p242_p9), %s818_s9, 512 }
  0x12   : > { %v660_v19 = vld [vmem:[%s1109_s2] ss:$0 sm:$0xff] (!%p242_p9)  ;;  %v811_v29 = vld [vmem:[%s1112_s5 + $0x30] sm:$0xff] (!%p242_p9)   ;;  %v812_v30 = vld [vmem:[%s1112_s5 + $0x38] sm:$0xff] (!%p242_p9)  }
  0x13   : > { %v663_v31 = vld [vmem:[%s1111_s4] ss:$0 sm:$0xff] (!%p242_p9) }
  0x14   : > { %716 = vmatpush3.bf16.msra.mxu1 (!%p242_p9), %v798_v3  ;;  %v672_v41 = vld [vmem:[%s1113_s6] ss:$0 sm:$0xff] (!%p242_p9) }
  0x15   : > { %s1122_s15 = smov (!%p274_p10, %s658_s15), 3  ;;  %717 = vmatprep.subr.bf16.mxu1 %v877_v1 }
  0x16   : > { %s659_s20 = sshll.u32 %s1122_s15, 3  ;;  %s657_s15 = sshll.u32 %s270_s14, 4 }
  0x17   : > { %s277_s23 = scalar_lea.vmem %s1107_s0, %s659_s20  ;;  %s272_s18 = scalar_lea.vmem [#allocation2], %s657_s15 }
  0x18   : > { %v281_v5 = vld [vmem:[%s277_s23] sm:$0xff]  ;;  %v282_v6 = vld [vmem:[%s277_s23 + $0x8] sm:$0xff]  ;;  %718 = vmatpush3.bf16.msra.mxu1 %v799_v4  ;;  %s591_s19 = sshll.u32 %s272_s18, 4  ;;  %s686_s20 = sshll.u32 %s943_s28, 8  ;;  %s1059_s19 = int_to_ptr.vmem [resolvable:$true] %s591_s19 }
  0x19   : > { %v283_v7 = vpack.c.bf16 %v282_v6, %v281_v5  ;;  %719 = vmatprep.subr.bf16.mxu1 %v877_v1  ;;  %s1064_s23 = scalar_lea.hbm %s1114_s7, %s686_s20  ;;  %s1066_s28 = scalar_lea.sflag [#allocation3], %s270_s14 }
  0x1a   : > { %s813_s29 = scalar_lea.vmem %s1059_s19, 256  ;;  %p820_p0 = scmp.lt.s32.totalorder %s1059_s19, %s818_s9 }
  0x1b   : > { %710 = vmatmul.mubr.msk.bf16.vlgmr.msra.gmra.mrb[0].mxu0 %vm299_vm1, %v283_v7  ;;  %p814_p11 = scmp.ne.s32.totalorder %s1059_s19, %s813_s29  ;;  %p821_p1 = scmp.lt.s32.totalorder %s819_s13, %s813_s29 }
  0x1c   : > { %749 = vmatprep.mubr.msk.bf16.mxu0 %vm878_vm0, %v877_v1  ;;  %720 = vmatpush3.bf16.msra.mxu1 %v800_v8 }
  0x1d   : > { %721 = vmatprep.subr.bf16.mxu1 %v877_v1  ;;  %734 = vmatpush3.bf16.msra.mxu0 %v805_v13  ;;  %p815_p12 = pnand %p814_p11, %p960_p5  ;;  %p822_p2 = por %p821_p1, %p820_p0 }
  0x1e   : > { %735 = vmatprep.subr.bf16.mxu0 %v877_v1 }
  0x1f   : > { %p816_p13 = pneg %p815_p12 }
  0x20   : > { %722 = vmatpush3.bf16.msra.mxu1 %v801_v9 }
  0x21   : > { %723 = vmatprep.subr.bf16.mxu1 %v877_v1  ;;  %736 = vmatpush3.bf16.msra.mxu0 %v806_v14  ;;  %p823_p3 = pnand %p822_p2, %p816_p13 }
  0x22   : > { %737 = vmatprep.subr.bf16.mxu0 %v877_v1 }
  0x24   : > { %724 = vmatpush3.bf16.msra.mxu1 %v802_v10 }
  0x25   : > { %725 = vmatprep.subr.bf16.mxu1 %v877_v1  ;;  %738 = vmatpush3.bf16.msra.mxu0 %v807_v15 }
  0x26   : > { %739 = vmatprep.subr.bf16.mxu0 %v877_v1 }
  0x28   : > { %726 = vmatpush3.bf16.msra.mxu1 %v803_v11 }
  0x29   : > { %727 = vmatprep.subr.bf16.mxu1 %v877_v1  ;;  %740 = vmatpush3.bf16.msra.mxu0 %v808_v16 }
  0x2a   : > { %741 = vmatprep.subr.bf16.mxu0 %v877_v1 }
  0x2c   : > { %728 = vmatpush3.bf16.msra.mxu1 %v804_v12 }
  0x2d   : > { %742 = vmatpush3.bf16.msra.mxu0 %v809_v17 }
  0x2e   : > { %743 = vmatprep.subr.bf16.mxu0 %v877_v1 }
  0x31   : > { %744 = vmatpush3.bf16.msra.mxu0 %v810_v18 }
  0x32   : > { %745 = vmatprep.subr.bf16.mxu0 %v877_v1 }
  0x35   : > { %746 = vmatpush3.bf16.msra.mxu0 %v811_v29 }
  0x36   : > { %747 = vmatprep.subr.bf16.mxu0 %v877_v1 }
  0x39   : > { %748 = vmatpush3.bf16.msra.mxu0 %v812_v30 }
  0xee   : > { %v337_v20 = vpop.f32.mrb[0].mxu0 }
  0xef   : > { %v338_v21 = vadd.f32 %v660_v19, %v337_v20  ;;  %v711_v22 = vpop.f32.mrb[1].mxu0 }
  0xf0   : > { %v340_v23 = vpop.f32.mrb[2].mxu0 }
  0xf1   : > { %v341_v24 = vadd.f32 %v660_v19, %v340_v23  ;;  %v712_v25 = vpop.f32.mrb[3].mxu0  ;;  %v344_v26 = vmax.f32 %v338_v21, 0.0 }
  0xf3   : > { %v345_v27 = vmax.f32 %v341_v24, 0.0 }
  0xf5   : > { %v346_v28 = vpack.c.bf16 %v345_v27, %v344_v26 }
  0xf7   : > { %730 = vmatmul.mubr.bf16.vlgmr.msra.gmra.mrb[0].mxu1 %v346_v28 }
 0x1ca   : > { %v452_v32 = vpop.f32.mrb[0].mxu1 }
 0x1cb   : > { %v453_v33 = vadd.f32 %v663_v31, %v452_v32  ;;  %v731_v34 = vpop.f32.mrb[1].mxu1 }
 0x1cc   : > { %v455_v35 = vpop.f32.mrb[2].mxu1 }
 0x1cd   : > { %v456_v36 = vadd.f32 %v663_v31, %v455_v35  ;;  %v732_v37 = vpop.f32.mrb[3].mxu1  ;;  %v459_v38 = vmax.f32 %v453_v33, 0.0 }
 0x1cf   : > { %v460_v39 = vmax.f32 %v456_v36, 0.0 }
 0x1d1   : > { %v461_v40 = vpack.c.bf16 %v460_v39, %v459_v38 }
 0x1d3   : > { %750 = vmatmul.mubr.bf16.vlgmr.msra.gmra.mrb[4].mxu0 %v461_v40 }
 0x2a6   : > { %v567_v42 = vpop.f32.mrb[4].mxu0 }
 0x2a7   : > { %v568_v43 = vadd.f32 %v672_v41, %v567_v42  ;;  %v751_v44 = vpop.f32.mrb[5].mxu0 }
 0x2a8   : > { %v570_v45 = vpop.f32.mrb[6].mxu0 }
 0x2a9   : > { %575 = vst.msk [vmem:[%s272_s18] sm:$0xff] %vm574_vm2, %v568_v43  ;;  %v571_v46 = vadd.f32 %v672_v41, %v570_v45  ;;  %v752_v47 = vpop.f32.mrb[7].mxu0 }
 0x2ab   : > { %576 = vst.msk [vmem:[%s272_s18 + $0x8] sm:$0xff] %vm574_vm2, %v571_v46 }
 0x2ac   : > { %826 = shalt.err (!%p823_p3)
}
 0x2ad   : > { %s827_s14 = scalar_lea.hbm %s1064_s23, 256  ;;  %s831_s17 = scalar_lea.hbm %s1114_s7, 512 }
 0x2ae   : > { %p828_p4 = scmp.ne.s32.totalorder %s1064_s23, %s827_s14  ;;  %p832_p9 = scmp.lt.u32.totalorder %s1064_s23, %s1114_s7 }
 0x2af   : > { %p833_p10 = scmp.lt.u32.totalorder %s831_s17, %s827_s14  ;;  %p835_p12 = scmp.lt.u32.totalorder %s827_s14, %s1064_s23 }
 0x2b0   : > { %p829_p7 = pnand %p828_p4, %p960_p5 }
 0x2b1   : > { %p834_p11 = por %p833_p10, %p832_p9 }
 0x2b2   : > { %p830_p8 = pneg %p829_p7 }
 0x2b3   : > { %p836_p13 = por %p835_p12, %p834_p11 }
 0x2b5   : > { %p837_p0 = pnand %p836_p13, %p830_p8 }
 0x2b7   : > { %840 = shalt.err (!%p837_p0)
}
 0x2b8   : > { %s880_s21 = smov 128   ;;  %s881_s22 = smov 8  }
 0x2b9   : > { %753 = dma.vmem_to_hbm [thread:$0]  (%p960_p5), %s1059_s19, 256, %s1064_s23, %s1066_s28, %s880_s21, %s880_s21, %s881_s22  }
 0x2ba PF: > { %p759_p1 = scmp.ge.s32.totalorder %s875_s27, 2  ;;  %s606_s29 = sand.u32 1, %s863_s24  }
 0x2bb   : > { %s607_s8 = scalar_lea.sflag [#allocation3], %s606_s29 }
 0x2bc   : > { %p756_p2 = pnand %p759_p1, %p964_p6 }
 0x2be   : > { %858 = dma.done.wait (!%p756_p2), %s607_s8, 256  }
 0x2bf   : > { %860 = vsyncadd (!%p756_p2), %s607_s8, 4294967040  ;;  %p17_p3 = scmp.ge.s32.totalorder %s947_s30, 4   ;;  %s1117_s24 = smov %s867_s25 }
 0x2c0   : > { %s1118_s25 = smov %s871_s26  ;;  %s1119_s26 = smov %s958_s10 }
 0x2c1   : > { %s1120_s27 = smov %s947_s30  ;;  %19 = sbr.rel (!%p17_p3) target bundleno = 3 (0x3), region = 83 }
 0x2c8   :  { %612 = vsyncpa [#allocation3], 1 }
 0x2c9   :  { %614 = vsyncpa [#allocation3 + $0x1], 1 }

</bundles_post_ra>
